<compile_context>
chip_gen: v6e
topology: v6e:2x2x1
jax: 0.10.0
libtpu: 0.0.40
codegen_flags: <defaults>
</compile_context>

<pallas_src>
import math

import jax
import jax.numpy as jnp
from jax import lax
from jax.experimental import pallas as pl
from jax.experimental.pallas import tpu as pltpu


# -----------------------------------------------------------------------------
# Tuning knobs
# -----------------------------------------------------------------------------
_COALESCE_FRAME_BYTES = 512 * 1024    # below this, per-frame DMAs are descriptor-bound
_VMEM_BLOCK_BYTES = 4 * 1024 * 1024   # staged block budget (x4 once in+out double-buffered)
_MAX_BLOCK_FRAMES = 32                # caps the in-kernel copy unroll
_SMALL_CLIP_BYTES = 1 * 1024 * 1024   # below this, plain jnp.flip beats a pallas_call launch
_NSEM = 16                            # HBM->HBM DMAs kept in flight per chunk (frame-DMA path)


def _pick_block_frames(T, frame_bytes):
    """Largest divisor of T (<= _MAX_BLOCK_FRAMES) whose block fits the VMEM budget."""
    best = 1
    for bt in range(1, min(T, _MAX_BLOCK_FRAMES) + 1):
        if T % bt == 0 and bt * frame_bytes <= _VMEM_BLOCK_BYTES:
            best = bt
    return best


# -----------------------------------------------------------------------------
# Path 1: coalesced flip (KB-scale frames) — BlockSpec pipelining, VMEM staging
# -----------------------------------------------------------------------------
def _flip_coalesced(x, block_frames):
    T = x.shape[0]
    rest = x.shape[1:]
    nrest = len(rest)
    nb = T // block_frames            # block_frames divides T by construction

    def kernel(x_ref, o_ref):
        # Reverse the leading (time) axis of the staged block.  Pure VMEM
        # ld/st copies along the leading axis; trailing dims are whole so the
        # (8,128) block constraint never triggers.
        for k in range(block_frames):
            o_ref[k] = x_ref[block_frames - 1 - k]

    return pl.pallas_call(
        kernel,
        out_shape=jax.ShapeDtypeStruct(x.shape, x.dtype),
        grid=(nb,),
        # Input block index is mirrored; the within-block frame order is
        # reversed in the kernel, giving out[t] = in[T-1-t] overall.
        in_specs=[pl.BlockSpec((block_frames,) + rest,
                               lambda i: (nb - 1 - i,) + (0,) * nrest)],
        out_specs=pl.BlockSpec((block_frames,) + rest,
                               lambda i: (i,) + (0,) * nrest),
        compiler_params=pltpu.CompilerParams(
            dimension_semantics=("parallel",)),     # v7x: shard blocks over 2 TCs
    )(x)


# -----------------------------------------------------------------------------
# Path 2: per-frame HBM->HBM DMA flip (large frames) — no VMEM round trip
# -----------------------------------------------------------------------------
def _flip_frame_dma(x):
    T = x.shape[0]
    nchunk = 2 if T >= 2 else 1       # unconditional megacore split (v7x); cheap on 1-TC
    per = pl.cdiv(T, nchunk)          # chunk 1 may be one frame short for odd T

    def kernel(x_hbm, o_hbm, sem):
        c = pl.program_id(0)
        lo = c * per
        n = jnp.minimum(per, T - lo)  # valid frames in this chunk (handles odd T)

        def frame_copy(k, slot):
            dst = lo + k              # destination frame index
            src = T - 1 - dst         # temporally mirrored source frame
            return pltpu.make_async_copy(x_hbm.at[src], o_hbm.at[dst], sem.at[slot])

        # Prologue: fill the in-flight window — no per-iteration branch.
        def prologue(k, carry):
            frame_copy(k, k % _NSEM).start()
            return carry
        lax.fori_loop(0, jnp.minimum(_NSEM, n), prologue, 0)

        # Steady state: retire the copy issued _NSEM iterations ago, then issue.
        def steady(k, carry):
            frame_copy(k - _NSEM, k % _NSEM).wait()
            frame_copy(k, k % _NSEM).start()
            return carry
        lax.fori_loop(_NSEM, n, steady, 0)

        # Drain the (up to _NSEM) copies still in flight for this chunk.
        def drain(k, carry):
            frame_copy(k, k % _NSEM).wait()
            return carry
        lax.fori_loop(jnp.maximum(n - _NSEM, 0), n, drain, 0)

    return pl.pallas_call(
        kernel,
        out_shape=jax.ShapeDtypeStruct(x.shape, x.dtype),
        grid=(nchunk,),
        in_specs=[pl.BlockSpec(memory_space=pl.ANY)],   # stay in HBM
        out_specs=pl.BlockSpec(memory_space=pl.ANY),    # written via DMA only
        scratch_shapes=[pltpu.SemaphoreType.DMA((_NSEM,))],
        compiler_params=pltpu.CompilerParams(
            dimension_semantics=("parallel",)),
    )(x)


# -----------------------------------------------------------------------------
# Dispatcher + module-level wrapper
# -----------------------------------------------------------------------------
def _pallas_time_flip(x, *, force_frame_dma=False):
    """Reverse `x` along axis 0 (time) with a Pallas TPU kernel."""
    T = x.shape[0]
    frame_bytes = math.prod(x.shape[1:]) * x.dtype.itemsize
    if force_frame_dma or x.ndim < 3 or frame_bytes >= _COALESCE_FRAME_BYTES:
        # Multi-hundred-KB+ frames: per-frame HBM->HBM DMAs already hit the
        # HBM roofline and avoid any VMEM round trip.
        return _flip_frame_dma(x)
    # KB-scale frames: coalesce B frames per step through a VMEM-staged block
    # so the per-DMA fixed cost is amortized B-fold.
    bt = _pick_block_frames(T, frame_bytes)
    return _flip_coalesced(x, bt)


def random_time_reverse(x, key, p=0.5):
    """Pallas equivalent of RandomTimeReverse.forward.

    The python-side `random.random() < p` of the PyTorch module is replaced by
    a deterministic jax.random draw from `key`.  Clips below ~1 MiB go through
    XLA's fused jnp.flip (kernel launch overhead dominates there); larger
    clips use the Pallas flip kernels above.
    """
    # TODO(synk): the original module draws from Python's global RNG; here the
    # randomness comes from an explicit jax.random key argument.
    total_bytes = math.prod(x.shape) * x.dtype.itemsize
    if total_bytes < _SMALL_CLIP_BYTES:
        flip_fn = lambda v: jnp.flip(v, axis=0)
    else:
        flip_fn = _pallas_time_flip
    do_flip = jax.random.uniform(key) < p
    return lax.cond(do_flip, flip_fn, lambda v: v, x)


# Jitted entry with `x` donated so the no-flip identity branch of lax.cond can
# alias input->output instead of materializing a defensive HBM copy of x.
random_time_reverse_jit = jax.jit(
    random_time_reverse, static_argnames=("p",), donate_argnums=(0,))


if __name__ == "__main__":
    key = jax.random.PRNGKey(0)
    k_data, k_flip = jax.random.split(key)

    # Small video clip: T=8 frames, C=4 channels, 16x16 spatial.
    T, C, H, W = 8, 4, 16, 16
    x = jax.random.normal(k_data, (T, C, H, W), dtype=jnp.float32)
    x_rev_ref = jnp.flip(x, axis=0)

    # 1) Coalesced VMEM-staged flip kernel (default path for KB-scale frames).
    y_coal = jax.block_until_ready(_pallas_time_flip(x))
    assert y_coal.shape == x.shape and y_coal.dtype == x.dtype
    assert jnp.array_equal(y_coal, x_rev_ref), "coalesced flip kernel mismatch"

    # 2) Per-frame HBM->HBM DMA flip kernel (path used for >=512 KB frames).
    y_dma = jax.block_until_ready(_pallas_time_flip(x, force_frame_dma=True))
    assert y_dma.shape == x.shape and y_dma.dtype == x.dtype
    assert jnp.array_equal(y_dma, x_rev_ref), "frame-DMA flip kernel mismatch"

    # 3) Full module semantics: random decision + conditional flip.
    p = 0.5
    y = jax.block_until_ready(random_time_reverse(x, k_flip, p=p))
    flipped = bool(jax.random.uniform(k_flip) < p)
    expected = x_rev_ref if flipped else x
    assert y.shape == x.shape and y.dtype == x.dtype
    assert jnp.array_equal(y, expected), "random_time_reverse mismatch"

    # 4) Jitted + donated wrapper (donate a copy so `x` stays usable here).
    y_jit = jax.block_until_ready(random_time_reverse_jit(jnp.copy(x), k_flip, p=p))
    assert jnp.array_equal(y_jit, expected), "jitted wrapper mismatch"

    print("KERNEL_OK")
</pallas_src>

<mosaic_0001>
module attributes {stable_mosaic.version = 11 : i64} {
  func.func @kernel(%arg0: i32, %arg1: memref<8x4x16x16xf32, #tpu.memory_space<vmem>>, %arg2: memref<8x4x16x16xf32, #tpu.memory_space<vmem>>) attributes {dimension_semantics = [#tpu.dimension_semantics<parallel>], iteration_bounds = array<i64: 1>, scalar_prefetch = 0 : i64, scratch_operands = 0 : i64, tpu.core_type = #tpu.core_type<tc>, window_params = [{transform_indices = @transform_0, window_bounds = array<i64: 8, 4, 16, 16>}, {transform_indices = @transform_1, window_bounds = array<i64: 8, 4, 16, 16>}]} {
    %c7 = arith.constant 7 : index
    %c0 = arith.constant 0 : index
    %c0_0 = arith.constant 0 : index
    %c0_1 = arith.constant 0 : index
    %0 = vector.load %arg1[%c7, %c0, %c0_0, %c0_1] : memref<8x4x16x16xf32, #tpu.memory_space<vmem>>, vector<1x4x16x16xf32>
    %1 = vector.shape_cast %0 : vector<1x4x16x16xf32> to vector<4x16x16xf32>
    %c0_2 = arith.constant 0 : index
    %c0_3 = arith.constant 0 : index
    %c0_4 = arith.constant 0 : index
    %c0_5 = arith.constant 0 : index
    %2 = vector.load %arg2[%c0_2, %c0_3, %c0_4, %c0_5] : memref<8x4x16x16xf32, #tpu.memory_space<vmem>>, vector<1x4x16x16xf32>
    %3 = vector.shape_cast %2 : vector<1x4x16x16xf32> to vector<4x16x16xf32>
    %4 = vector.shape_cast %1 : vector<4x16x16xf32> to vector<1x4x16x16xf32>
    tpu.vector_store %arg2[%c0_2, %c0_3, %c0_4, %c0_5], %4 {strides = array<i32>} : memref<8x4x16x16xf32, #tpu.memory_space<vmem>>, vector<1x4x16x16xf32>,
    %c6 = arith.constant 6 : index
    %c0_6 = arith.constant 0 : index
    %c0_7 = arith.constant 0 : index
    %c0_8 = arith.constant 0 : index
    %5 = vector.load %arg1[%c6, %c0_6, %c0_7, %c0_8] : memref<8x4x16x16xf32, #tpu.memory_space<vmem>>, vector<1x4x16x16xf32>
    %6 = vector.shape_cast %5 : vector<1x4x16x16xf32> to vector<4x16x16xf32>
    %c1 = arith.constant 1 : index
    %c0_9 = arith.constant 0 : index
    %c0_10 = arith.constant 0 : index
    %c0_11 = arith.constant 0 : index
    %7 = vector.load %arg2[%c1, %c0_9, %c0_10, %c0_11] : memref<8x4x16x16xf32, #tpu.memory_space<vmem>>, vector<1x4x16x16xf32>
    %8 = vector.shape_cast %7 : vector<1x4x16x16xf32> to vector<4x16x16xf32>
    %9 = vector.shape_cast %6 : vector<4x16x16xf32> to vector<1x4x16x16xf32>
    tpu.vector_store %arg2[%c1, %c0_9, %c0_10, %c0_11], %9 {strides = array<i32>} : memref<8x4x16x16xf32, #tpu.memory_space<vmem>>, vector<1x4x16x16xf32>,
    %c5 = arith.constant 5 : index
    %c0_12 = arith.constant 0 : index
    %c0_13 = arith.constant 0 : index
    %c0_14 = arith.constant 0 : index
    %10 = vector.load %arg1[%c5, %c0_12, %c0_13, %c0_14] : memref<8x4x16x16xf32, #tpu.memory_space<vmem>>, vector<1x4x16x16xf32>
    %11 = vector.shape_cast %10 : vector<1x4x16x16xf32> to vector<4x16x16xf32>
    %c2 = arith.constant 2 : index
    %c0_15 = arith.constant 0 : index
    %c0_16 = arith.constant 0 : index
    %c0_17 = arith.constant 0 : index
    %12 = vector.load %arg2[%c2, %c0_15, %c0_16, %c0_17] : memref<8x4x16x16xf32, #tpu.memory_space<vmem>>, vector<1x4x16x16xf32>
    %13 = vector.shape_cast %12 : vector<1x4x16x16xf32> to vector<4x16x16xf32>
    %14 = vector.shape_cast %11 : vector<4x16x16xf32> to vector<1x4x16x16xf32>
    tpu.vector_store %arg2[%c2, %c0_15, %c0_16, %c0_17], %14 {strides = array<i32>} : memref<8x4x16x16xf32, #tpu.memory_space<vmem>>, vector<1x4x16x16xf32>,
    %c4 = arith.constant 4 : index
    %c0_18 = arith.constant 0 : index
    %c0_19 = arith.constant 0 : index
    %c0_20 = arith.constant 0 : index
    %15 = vector.load %arg1[%c4, %c0_18, %c0_19, %c0_20] : memref<8x4x16x16xf32, #tpu.memory_space<vmem>>, vector<1x4x16x16xf32>
    %16 = vector.shape_cast %15 : vector<1x4x16x16xf32> to vector<4x16x16xf32>
    %c3 = arith.constant 3 : index
    %c0_21 = arith.constant 0 : index
    %c0_22 = arith.constant 0 : index
    %c0_23 = arith.constant 0 : index
    %17 = vector.load %arg2[%c3, %c0_21, %c0_22, %c0_23] : memref<8x4x16x16xf32, #tpu.memory_space<vmem>>, vector<1x4x16x16xf32>
    %18 = vector.shape_cast %17 : vector<1x4x16x16xf32> to vector<4x16x16xf32>
    %19 = vector.shape_cast %16 : vector<4x16x16xf32> to vector<1x4x16x16xf32>
    tpu.vector_store %arg2[%c3, %c0_21, %c0_22, %c0_23], %19 {strides = array<i32>} : memref<8x4x16x16xf32, #tpu.memory_space<vmem>>, vector<1x4x16x16xf32>,
    %c3_24 = arith.constant 3 : index
    %c0_25 = arith.constant 0 : index
    %c0_26 = arith.constant 0 : index
    %c0_27 = arith.constant 0 : index
    %20 = vector.load %arg1[%c3_24, %c0_25, %c0_26, %c0_27] : memref<8x4x16x16xf32, #tpu.memory_space<vmem>>, vector<1x4x16x16xf32>
    %21 = vector.shape_cast %20 : vector<1x4x16x16xf32> to vector<4x16x16xf32>
    %c4_28 = arith.constant 4 : index
    %c0_29 = arith.constant 0 : index
    %c0_30 = arith.constant 0 : index
    %c0_31 = arith.constant 0 : index
    %22 = vector.load %arg2[%c4_28, %c0_29, %c0_30, %c0_31] : memref<8x4x16x16xf32, #tpu.memory_space<vmem>>, vector<1x4x16x16xf32>
    %23 = vector.shape_cast %22 : vector<1x4x16x16xf32> to vector<4x16x16xf32>
    %24 = vector.shape_cast %21 : vector<4x16x16xf32> to vector<1x4x16x16xf32>
    tpu.vector_store %arg2[%c4_28, %c0_29, %c0_30, %c0_31], %24 {strides = array<i32>} : memref<8x4x16x16xf32, #tpu.memory_space<vmem>>, vector<1x4x16x16xf32>,
    %c2_32 = arith.constant 2 : index
    %c0_33 = arith.constant 0 : index
    %c0_34 = arith.constant 0 : index
    %c0_35 = arith.constant 0 : index
    %25 = vector.load %arg1[%c2_32, %c0_33, %c0_34, %c0_35] : memref<8x4x16x16xf32, #tpu.memory_space<vmem>>, vector<1x4x16x16xf32>
    %26 = vector.shape_cast %25 : vector<1x4x16x16xf32> to vector<4x16x16xf32>
    %c5_36 = arith.constant 5 : index
    %c0_37 = arith.constant 0 : index
    %c0_38 = arith.constant 0 : index
    %c0_39 = arith.constant 0 : index
    %27 = vector.load %arg2[%c5_36, %c0_37, %c0_38, %c0_39] : memref<8x4x16x16xf32, #tpu.memory_space<vmem>>, vector<1x4x16x16xf32>
    %28 = vector.shape_cast %27 : vector<1x4x16x16xf32> to vector<4x16x16xf32>
    %29 = vector.shape_cast %26 : vector<4x16x16xf32> to vector<1x4x16x16xf32>
    tpu.vector_store %arg2[%c5_36, %c0_37, %c0_38, %c0_39], %29 {strides = array<i32>} : memref<8x4x16x16xf32, #tpu.memory_space<vmem>>, vector<1x4x16x16xf32>,
    %c1_40 = arith.constant 1 : index
    %c0_41 = arith.constant 0 : index
    %c0_42 = arith.constant 0 : index
    %c0_43 = arith.constant 0 : index
    %30 = vector.load %arg1[%c1_40, %c0_41, %c0_42, %c0_43] : memref<8x4x16x16xf32, #tpu.memory_space<vmem>>, vector<1x4x16x16xf32>
    %31 = vector.shape_cast %30 : vector<1x4x16x16xf32> to vector<4x16x16xf32>
    %c6_44 = arith.constant 6 : index
    %c0_45 = arith.constant 0 : index
    %c0_46 = arith.constant 0 : index
    %c0_47 = arith.constant 0 : index
    %32 = vector.load %arg2[%c6_44, %c0_45, %c0_46, %c0_47] : memref<8x4x16x16xf32, #tpu.memory_space<vmem>>, vector<1x4x16x16xf32>
    %33 = vector.shape_cast %32 : vector<1x4x16x16xf32> to vector<4x16x16xf32>
    %34 = vector.shape_cast %31 : vector<4x16x16xf32> to vector<1x4x16x16xf32>
    tpu.vector_store %arg2[%c6_44, %c0_45, %c0_46, %c0_47], %34 {strides = array<i32>} : memref<8x4x16x16xf32, #tpu.memory_space<vmem>>, vector<1x4x16x16xf32>,
    %c0_48 = arith.constant 0 : index
    %c0_49 = arith.constant 0 : index
    %c0_50 = arith.constant 0 : index
    %c0_51 = arith.constant 0 : index
    %35 = vector.load %arg1[%c0_48, %c0_49, %c0_50, %c0_51] : memref<8x4x16x16xf32, #tpu.memory_space<vmem>>, vector<1x4x16x16xf32>
    %36 = vector.shape_cast %35 : vector<1x4x16x16xf32> to vector<4x16x16xf32>
    %c7_52 = arith.constant 7 : index
    %c0_53 = arith.constant 0 : index
    %c0_54 = arith.constant 0 : index
    %c0_55 = arith.constant 0 : index
    %37 = vector.load %arg2[%c7_52, %c0_53, %c0_54, %c0_55] : memref<8x4x16x16xf32, #tpu.memory_space<vmem>>, vector<1x4x16x16xf32>
    %38 = vector.shape_cast %37 : vector<1x4x16x16xf32> to vector<4x16x16xf32>
    %39 = vector.shape_cast %36 : vector<4x16x16xf32> to vector<1x4x16x16xf32>
    tpu.vector_store %arg2[%c7_52, %c0_53, %c0_54, %c0_55], %39 {strides = array<i32>} : memref<8x4x16x16xf32, #tpu.memory_space<vmem>>, vector<1x4x16x16xf32>,
    return
  }
  func.func @transform_0(%arg0: i32) -> (i32, i32, i32, i32) {
    %c0_i32 = arith.constant 0 : i32
    %0 = arith.subi %c0_i32, %arg0 : i32
    %c0_i32_0 = arith.constant 0 : i32
    %c0_i32_1 = arith.constant 0 : i32
    %c0_i32_2 = arith.constant 0 : i32
    %c0_i32_3 = arith.constant 0 : i32
    return %0, %c0_i32_0, %c0_i32_1, %c0_i32_2 : i32, i32, i32, i32
  }
  func.func @transform_1(%arg0: i32) -> (i32, i32, i32, i32) {
    %c0_i32 = arith.constant 0 : i32
    %c0_i32_0 = arith.constant 0 : i32
    %c0_i32_1 = arith.constant 0 : i32
    %c0_i32_2 = arith.constant 0 : i32
    return %arg0, %c0_i32, %c0_i32_0, %c0_i32_1 : i32, i32, i32, i32
  }
}

</mosaic_0001>

<bundles_post_ra>
// kernel: tpu_custom_call.1
= control target key start
LH: loop header
LB: loop body
LE: loop exit
PB: predicated region body
PF: predicated region fallthrough
CT: control target
= control target key end

     0   :  { %6 = vsyncpa [#allocation3], 0  ;;  %s330_s0 = inlined_call_operand.hbm [shape: f32[8,4,16,16], index: 0, kind: input, shape index: {}]   ;;  %s331_s1 = inlined_call_operand.hbm [shape: f32[8,4,16,16], index: 1, kind: output, shape index: {}]  }
   0x1   :  { %7 = vsyncpa [#allocation4], 0  ;;  %s240_s6 = smov [#allocation2]  }
   0x2   :  { %s18_s7 = sshll.u32 %s240_s6, 4  ;;  %s19_s7 = int_to_ptr.vmem [resolvable:$true] %s18_s7 }
   0x3   :  { %s204_s8 = scalar_lea.vmem %s19_s7, 8192  ;;  %p209_p1 = scmp.lt.s32.totalorder %s19_s7, %s19_s7 }
   0x4   :  { %p205_p0 = scmp.ne.s32.totalorder %s19_s7, %s204_s8  ;;  %p210_p2 = scmp.lt.s32.totalorder %s204_s8, %s204_s8 }
   0x6   :  { %p211_p3 = por %p210_p2, %p209_p1 }
   0x8   :  { %p212_p4 = pnand %p211_p3, %p205_p0 }
   0xa   :  { %215 = shalt.err (!%p212_p4)
}
   0xb   :  { %s241_s9 = smov 128   ;;  %s242_s10 = smov 8  }
   0xc   :  { %24 = dma.hbm_to_vmem [thread:$0]  %s330_s0, 8192, %s19_s7, [#allocation3], %s241_s9, %s241_s9, %s242_s10  }
   0xd   :  { %236 = dma.done.wait [#allocation3], 8192  }
   0xe   :  { %237 = vsyncadd [#allocation3], 4294959104  ;;  %vm39_vm0 = vcmask 130048   ;;  %v31_v0 = vld [vmem:[#allocation2 + $0x1c0] sm:$0xff]  ;;  %v32_v1 = vld [vmem:[#allocation2 + $0x1c8] sm:$0xff]  ;;  %s243_s0 = smov [#allocation5]  }
   0xf   :  { %v33_v2 = vld [vmem:[#allocation2 + $0x1d0] sm:$0xff]  ;;  %40 = vst.msk [vmem:[#allocation5] sm:$0xff] %vm39_vm0, %v31_v0  ;;  %41 = vst.msk [vmem:[#allocation5 + $0x8] sm:$0xff] %vm39_vm0, %v32_v1  ;;  %v34_v3 = vld [vmem:[#allocation2 + $0x1d8] sm:$0xff]  ;;  %s178_s13 = sshll.u32 %s243_s0, 4  ;;  %s179_s13 = int_to_ptr.vmem [resolvable:$true] %s178_s13 }
  0x10   :  { %42 = vst.msk [vmem:[#allocation5 + $0x10] sm:$0xff] %vm39_vm0, %v33_v2  ;;  %v35_v4 = vld [vmem:[#allocation2 + $0x1e0] sm:$0xff]  ;;  %v36_v5 = vld [vmem:[#allocation2 + $0x1e8] sm:$0xff]  ;;  %43 = vst.msk [vmem:[#allocation5 + $0x18] sm:$0xff] %vm39_vm0, %v34_v3  ;;  %s216_s14 = scalar_lea.vmem %s179_s13, 8192  ;;  %p221_p6 = scmp.lt.s32.totalorder %s179_s13, %s179_s13 }
  0x11   :  { %44 = vst.msk [vmem:[#allocation5 + $0x20] sm:$0xff] %vm39_vm0, %v35_v4  ;;  %45 = vst.msk [vmem:[#allocation5 + $0x28] sm:$0xff] %vm39_vm0, %v36_v5  ;;  %v37_v6 = vld [vmem:[#allocation2 + $0x1f0] sm:$0xff]  ;;  %v38_v7 = vld [vmem:[#allocation2 + $0x1f8] sm:$0xff]  ;;  %p217_p5 = scmp.ne.s32.totalorder %s179_s13, %s216_s14  ;;  %p222_p7 = scmp.lt.s32.totalorder %s216_s14, %s216_s14 }
  0x12   :  { %v49_v8 = vld [vmem:[#allocation2 + $0x180] sm:$0xff]  ;;  %46 = vst.msk [vmem:[#allocation5 + $0x30] sm:$0xff] %vm39_vm0, %v37_v6  ;;  %47 = vst.msk [vmem:[#allocation5 + $0x38] sm:$0xff] %vm39_vm0, %v38_v7  ;;  %v50_v9 = vld [vmem:[#allocation2 + $0x188] sm:$0xff] }
  0x13   :  { %58 = vst.msk [vmem:[#allocation5 + $0x40] sm:$0xff] %vm39_vm0, %v49_v8  ;;  %v51_v10 = vld [vmem:[#allocation2 + $0x190] sm:$0xff]  ;;  %v52_v11 = vld [vmem:[#allocation2 + $0x198] sm:$0xff]  ;;  %59 = vst.msk [vmem:[#allocation5 + $0x48] sm:$0xff] %vm39_vm0, %v50_v9  ;;  %p223_p8 = por %p222_p7, %p221_p6 }
  0x14   :  { %60 = vst.msk [vmem:[#allocation5 + $0x50] sm:$0xff] %vm39_vm0, %v51_v10  ;;  %61 = vst.msk [vmem:[#allocation5 + $0x58] sm:$0xff] %vm39_vm0, %v52_v11  ;;  %v53_v12 = vld [vmem:[#allocation2 + $0x1a0] sm:$0xff]  ;;  %v54_v13 = vld [vmem:[#allocation2 + $0x1a8] sm:$0xff] }
  0x15   :  { %v55_v14 = vld [vmem:[#allocation2 + $0x1b0] sm:$0xff]  ;;  %62 = vst.msk [vmem:[#allocation5 + $0x60] sm:$0xff] %vm39_vm0, %v53_v12  ;;  %63 = vst.msk [vmem:[#allocation5 + $0x68] sm:$0xff] %vm39_vm0, %v54_v13  ;;  %v56_v15 = vld [vmem:[#allocation2 + $0x1b8] sm:$0xff]  ;;  %p224_p9 = pnand %p223_p8, %p217_p5 }
  0x16   :  { %64 = vst.msk [vmem:[#allocation5 + $0x70] sm:$0xff] %vm39_vm0, %v55_v14  ;;  %v67_v16 = vld [vmem:[#allocation2 + $0x140] sm:$0xff]  ;;  %v68_v17 = vld [vmem:[#allocation2 + $0x148] sm:$0xff]  ;;  %65 = vst.msk [vmem:[#allocation5 + $0x78] sm:$0xff] %vm39_vm0, %v56_v15 }
  0x17   :  { %76 = vst.msk [vmem:[#allocation5 + $0x80] sm:$0xff] %vm39_vm0, %v67_v16  ;;  %77 = vst.msk [vmem:[#allocation5 + $0x88] sm:$0xff] %vm39_vm0, %v68_v17  ;;  %v69_v18 = vld [vmem:[#allocation2 + $0x150] sm:$0xff]  ;;  %v70_v19 = vld [vmem:[#allocation2 + $0x158] sm:$0xff] }
  0x18   :  { %v71_v20 = vld [vmem:[#allocation2 + $0x160] sm:$0xff]  ;;  %78 = vst.msk [vmem:[#allocation5 + $0x90] sm:$0xff] %vm39_vm0, %v69_v18  ;;  %79 = vst.msk [vmem:[#allocation5 + $0x98] sm:$0xff] %vm39_vm0, %v70_v19  ;;  %v72_v21 = vld [vmem:[#allocation2 + $0x168] sm:$0xff] }
  0x19   :  { %80 = vst.msk [vmem:[#allocation5 + $0xa0] sm:$0xff] %vm39_vm0, %v71_v20  ;;  %v73_v22 = vld [vmem:[#allocation2 + $0x170] sm:$0xff]  ;;  %v74_v23 = vld [vmem:[#allocation2 + $0x178] sm:$0xff]  ;;  %81 = vst.msk [vmem:[#allocation5 + $0xa8] sm:$0xff] %vm39_vm0, %v72_v21 }
  0x1a   :  { %82 = vst.msk [vmem:[#allocation5 + $0xb0] sm:$0xff] %vm39_vm0, %v73_v22  ;;  %83 = vst.msk [vmem:[#allocation5 + $0xb8] sm:$0xff] %vm39_vm0, %v74_v23  ;;  %v85_v24 = vld [vmem:[#allocation2 + $0x100] sm:$0xff]  ;;  %v86_v25 = vld [vmem:[#allocation2 + $0x108] sm:$0xff] }
  0x1b   :  { %v87_v26 = vld [vmem:[#allocation2 + $0x110] sm:$0xff]  ;;  %94 = vst.msk [vmem:[#allocation5 + $0xc0] sm:$0xff] %vm39_vm0, %v85_v24  ;;  %95 = vst.msk [vmem:[#allocation5 + $0xc8] sm:$0xff] %vm39_vm0, %v86_v25  ;;  %v88_v27 = vld [vmem:[#allocation2 + $0x118] sm:$0xff] }
  0x1c   :  { %96 = vst.msk [vmem:[#allocation5 + $0xd0] sm:$0xff] %vm39_vm0, %v87_v26  ;;  %v89_v28 = vld [vmem:[#allocation2 + $0x120] sm:$0xff]  ;;  %v90_v29 = vld [vmem:[#allocation2 + $0x128] sm:$0xff]  ;;  %97 = vst.msk [vmem:[#allocation5 + $0xd8] sm:$0xff] %vm39_vm0, %v88_v27 }
  0x1d   :  { %98 = vst.msk [vmem:[#allocation5 + $0xe0] sm:$0xff] %vm39_vm0, %v89_v28  ;;  %99 = vst.msk [vmem:[#allocation5 + $0xe8] sm:$0xff] %vm39_vm0, %v90_v29  ;;  %v91_v30 = vld [vmem:[#allocation2 + $0x130] sm:$0xff]  ;;  %v92_v31 = vld [vmem:[#allocation2 + $0x138] sm:$0xff] }
  0x1e   :  { %v103_v32 = vld [vmem:[#allocation2 + $0xc0] sm:$0xff]  ;;  %100 = vst.msk [vmem:[#allocation5 + $0xf0] sm:$0xff] %vm39_vm0, %v91_v30  ;;  %101 = vst.msk [vmem:[#allocation5 + $0xf8] sm:$0xff] %vm39_vm0, %v92_v31  ;;  %v104_v33 = vld [vmem:[#allocation2 + $0xc8] sm:$0xff] }
  0x1f   :  { %112 = vst.msk [vmem:[#allocation5 + $0x100] sm:$0xff] %vm39_vm0, %v103_v32  ;;  %v105_v34 = vld [vmem:[#allocation2 + $0xd0] sm:$0xff]  ;;  %v106_v35 = vld [vmem:[#allocation2 + $0xd8] sm:$0xff]  ;;  %113 = vst.msk [vmem:[#allocation5 + $0x108] sm:$0xff] %vm39_vm0, %v104_v33 }
  0x20   :  { %114 = vst.msk [vmem:[#allocation5 + $0x110] sm:$0xff] %vm39_vm0, %v105_v34  ;;  %115 = vst.msk [vmem:[#allocation5 + $0x118] sm:$0xff] %vm39_vm0, %v106_v35  ;;  %v107_v36 = vld [vmem:[#allocation2 + $0xe0] sm:$0xff]  ;;  %v108_v37 = vld [vmem:[#allocation2 + $0xe8] sm:$0xff] }
  0x21   :  { %v109_v38 = vld [vmem:[#allocation2 + $0xf0] sm:$0xff]  ;;  %116 = vst.msk [vmem:[#allocation5 + $0x120] sm:$0xff] %vm39_vm0, %v107_v36  ;;  %117 = vst.msk [vmem:[#allocation5 + $0x128] sm:$0xff] %vm39_vm0, %v108_v37  ;;  %v110_v39 = vld [vmem:[#allocation2 + $0xf8] sm:$0xff] }
  0x22   :  { %118 = vst.msk [vmem:[#allocation5 + $0x130] sm:$0xff] %vm39_vm0, %v109_v38  ;;  %v121_v40 = vld [vmem:[#allocation2 + $0x80] sm:$0xff]  ;;  %v122_v41 = vld [vmem:[#allocation2 + $0x88] sm:$0xff]  ;;  %119 = vst.msk [vmem:[#allocation5 + $0x138] sm:$0xff] %vm39_vm0, %v110_v39 }
  0x23   :  { %130 = vst.msk [vmem:[#allocation5 + $0x140] sm:$0xff] %vm39_vm0, %v121_v40  ;;  %131 = vst.msk [vmem:[#allocation5 + $0x148] sm:$0xff] %vm39_vm0, %v122_v41  ;;  %v123_v42 = vld [vmem:[#allocation2 + $0x90] sm:$0xff]  ;;  %v124_v43 = vld [vmem:[#allocation2 + $0x98] sm:$0xff] }
  0x24   :  { %v125_v44 = vld [vmem:[#allocation2 + $0xa0] sm:$0xff]  ;;  %132 = vst.msk [vmem:[#allocation5 + $0x150] sm:$0xff] %vm39_vm0, %v123_v42  ;;  %133 = vst.msk [vmem:[#allocation5 + $0x158] sm:$0xff] %vm39_vm0, %v124_v43  ;;  %v126_v45 = vld [vmem:[#allocation2 + $0xa8] sm:$0xff] }
  0x25   :  { %134 = vst.msk [vmem:[#allocation5 + $0x160] sm:$0xff] %vm39_vm0, %v125_v44  ;;  %v127_v46 = vld [vmem:[#allocation2 + $0xb0] sm:$0xff]  ;;  %v128_v47 = vld [vmem:[#allocation2 + $0xb8] sm:$0xff]  ;;  %135 = vst.msk [vmem:[#allocation5 + $0x168] sm:$0xff] %vm39_vm0, %v126_v45 }
  0x26   :  { %136 = vst.msk [vmem:[#allocation5 + $0x170] sm:$0xff] %vm39_vm0, %v127_v46  ;;  %137 = vst.msk [vmem:[#allocation5 + $0x178] sm:$0xff] %vm39_vm0, %v128_v47  ;;  %v139_v48 = vld [vmem:[#allocation2 + $0x40] sm:$0xff]  ;;  %v140_v49 = vld [vmem:[#allocation2 + $0x48] sm:$0xff] }
  0x27   :  { %v141_v50 = vld [vmem:[#allocation2 + $0x50] sm:$0xff]  ;;  %148 = vst.msk [vmem:[#allocation5 + $0x180] sm:$0xff] %vm39_vm0, %v139_v48  ;;  %149 = vst.msk [vmem:[#allocation5 + $0x188] sm:$0xff] %vm39_vm0, %v140_v49  ;;  %v142_v51 = vld [vmem:[#allocation2 + $0x58] sm:$0xff] }
  0x28   :  { %150 = vst.msk [vmem:[#allocation5 + $0x190] sm:$0xff] %vm39_vm0, %v141_v50  ;;  %v143_v52 = vld [vmem:[#allocation2 + $0x60] sm:$0xff]  ;;  %v144_v53 = vld [vmem:[#allocation2 + $0x68] sm:$0xff]  ;;  %151 = vst.msk [vmem:[#allocation5 + $0x198] sm:$0xff] %vm39_vm0, %v142_v51 }
  0x29   :  { %152 = vst.msk [vmem:[#allocation5 + $0x1a0] sm:$0xff] %vm39_vm0, %v143_v52  ;;  %153 = vst.msk [vmem:[#allocation5 + $0x1a8] sm:$0xff] %vm39_vm0, %v144_v53  ;;  %v145_v54 = vld [vmem:[#allocation2 + $0x70] sm:$0xff]  ;;  %v146_v55 = vld [vmem:[#allocation2 + $0x78] sm:$0xff] }
  0x2a   :  { %v156_v56 = vld [vmem:[#allocation2] sm:$0xff]  ;;  %154 = vst.msk [vmem:[#allocation5 + $0x1b0] sm:$0xff] %vm39_vm0, %v145_v54  ;;  %155 = vst.msk [vmem:[#allocation5 + $0x1b8] sm:$0xff] %vm39_vm0, %v146_v55  ;;  %v157_v57 = vld [vmem:[#allocation2 + $0x8] sm:$0xff] }
  0x2b   :  { %165 = vst.msk [vmem:[#allocation5 + $0x1c0] sm:$0xff] %vm39_vm0, %v156_v56  ;;  %v158_v58 = vld [vmem:[#allocation2 + $0x10] sm:$0xff]  ;;  %v159_v59 = vld [vmem:[#allocation2 + $0x18] sm:$0xff]  ;;  %166 = vst.msk [vmem:[#allocation5 + $0x1c8] sm:$0xff] %vm39_vm0, %v157_v57 }
  0x2c   :  { %167 = vst.msk [vmem:[#allocation5 + $0x1d0] sm:$0xff] %vm39_vm0, %v158_v58  ;;  %168 = vst.msk [vmem:[#allocation5 + $0x1d8] sm:$0xff] %vm39_vm0, %v159_v59  ;;  %v160_v60 = vld [vmem:[#allocation2 + $0x20] sm:$0xff]  ;;  %v161_v61 = vld [vmem:[#allocation2 + $0x28] sm:$0xff] }
  0x2d   :  { %v162_v62 = vld [vmem:[#allocation2 + $0x30] sm:$0xff]  ;;  %169 = vst.msk [vmem:[#allocation5 + $0x1e0] sm:$0xff] %vm39_vm0, %v160_v60  ;;  %170 = vst.msk [vmem:[#allocation5 + $0x1e8] sm:$0xff] %vm39_vm0, %v161_v61  ;;  %v163_v63 = vld [vmem:[#allocation2 + $0x38] sm:$0xff] }
  0x2e   :  { %171 = vst.msk [vmem:[#allocation5 + $0x1f0] sm:$0xff] %vm39_vm0, %v162_v62  ;;  %172 = vst.msk [vmem:[#allocation5 + $0x1f8] sm:$0xff] %vm39_vm0, %v163_v63 }
  0x2f   :  { %227 = shalt.err (!%p224_p9)
}
  0x30   :  { %184 = dma.vmem_to_hbm [thread:$0]  %s179_s13, 8192, %s331_s1, [#allocation4], %s241_s9, %s241_s9, %s242_s10  }
  0x31   :  { %238 = dma.done.wait [#allocation4], 8192  }
  0x32   :  { %239 = vsyncadd [#allocation4], 4294959104 }
  0x33   :  { %188 = vsyncpa [#allocation3], 1 }
  0x34   :  { %189 = vsyncpa [#allocation4], 1 }

</bundles_post_ra>
